<compile_context>
chip_gen: v7x
topology: tpu7x:2x2x1
jax: 0.10.0
libtpu: 0.0.40
codegen_flags: <defaults>
</compile_context>

<pallas_src>
import functools

import jax
import jax.numpy as jnp
from jax import lax
from jax.experimental import pallas as pl
from jax.experimental.pallas import tpu as pltpu


def _round_up(x, m):
    return ((x + m - 1) // m) * m


def _focal_loss_kernel(x_ref, t_ref, alpha_ref, out_ref, acc_ref, *,
                       gamma, n_total, needs_mask):
    p = pl.program_id(0)            # parallel (per-core) axis
    i = pl.program_id(1)            # row-block axis (reduction / "arbitrary")
    nblk = pl.num_programs(1)

    @pl.when(i == 0)
    def _():
        acc_ref[...] = jnp.zeros_like(acc_ref)

    x = x_ref[...].astype(jnp.float32)            # (TN, C), f32 math on-chip
    tn, c = x.shape

    # Numerically-stable log_softmax pieces; do NOT materialize full logp.
    m = jnp.max(x, axis=-1, keepdims=True)        # (TN, 1)
    z = x - m                                     # (TN, C)
    lse = jnp.log(jnp.sum(jnp.exp(z), axis=-1, keepdims=True))  # (TN, 1)

    # Gather z[target] / alpha[target] via one-hot (no dynamic gather on TPU).
    t = t_ref[...]                                # (TN, 1) int32
    cls_ids = lax.broadcasted_iota(jnp.int32, (tn, c), 1)
    onehot = (cls_ids == t).astype(jnp.float32)   # (TN, C)

    z_t = jnp.sum(z * onehot, axis=-1, keepdims=True)            # (TN, 1)
    logp_t = z_t - lse                                           # log p[target]
    p_t = jnp.exp(logp_t)                                        # class_probs

    alpha_t = jnp.sum(alpha_ref[...] * onehot, axis=-1, keepdims=True)

    one_minus_p = 1.0 - p_t
    if isinstance(gamma, int) or (isinstance(gamma, float)
                                  and float(gamma).is_integer()):
        # Repeated VPU multiplies; keeps the EUP slot free for the softmax exp.
        w = lax.integer_pow(one_minus_p, int(gamma))
    else:
        w = one_minus_p ** jnp.float32(gamma)
    loss = -(w * alpha_t) * logp_t                               # (TN, 1)

    if needs_mask:
        # Mask rows that are batch padding (global row id >= n_total).
        row_start = (p * nblk + i) * tn
        row_ids = row_start + lax.broadcasted_iota(jnp.int32, (tn, 1), 0)
        loss = jnp.where(row_ids < n_total, loss, 0.0)

    # Vector-shaped accumulator: one VPU add per step; single reduce at the end.
    acc_ref[...] += loss

    @pl.when(i == nblk - 1)
    def _():
        out_ref[...] = jnp.full(out_ref.shape, jnp.sum(acc_ref[...]),
                                dtype=jnp.float32)


def focal_loss(inputs, targets, *, gamma=2, alpha=None, reduction="mean",
               block_n=None, num_cores=2):
    """Pallas TPU focal loss.

    inputs:  (N, C) logits (any float dtype; streamed in native dtype)
    targets: (N,)   int class indices
    alpha:   optional (C,) per-class weights (None -> unweighted)
    """
    n, c = inputs.shape
    assert reduction in ("mean", "sum")
    # TODO(synk): reduction='none' (per-sample loss output) not wired up.
    # TODO(synk): vocab-scale C would need an inner grid axis over C with a
    #             streaming logsumexp; current kernel needs full (block_n, C)
    #             rows in one tile.

    num_cores = max(1, int(num_cores))
    itemsize = jnp.dtype(inputs.dtype).itemsize

    if block_n is None:
        # Largest sublane-aligned row tile with a single logits buffer <=~4 MiB
        # (x2 for double buffering) -- conservative across v5e/v6e/v7x VMEM.
        bn_cap = max(8, (4 * 1024 * 1024) // max(1, c * itemsize))
        rows_per_core = -(-n // num_cores)
        block_n = min(bn_cap, 1024, _round_up(rows_per_core, 8))
        block_n = max(8, (block_n // 8) * 8)
    assert block_n % 8 == 0, "block_n must be a multiple of 8 (sublane)"

    nblk_per_core = -(-n // (num_cores * block_n))
    n_pad = num_cores * nblk_per_core * block_n

    x = inputs                                       # keep native dtype in HBM
    t = targets.astype(jnp.int32).reshape(n, 1)
    if n_pad != n:
        x = jnp.pad(x, ((0, n_pad - n), (0, 0)))
        t = jnp.pad(t, ((0, n_pad - n), (0, 0)))
    if alpha is None:
        a = jnp.ones((1, c), jnp.float32)
    else:
        a = jnp.asarray(alpha, jnp.float32).reshape(1, c)

    kernel = functools.partial(_focal_loss_kernel, gamma=gamma, n_total=n,
                               needs_mask=(n_pad != n))

    # VMEM footprint estimate (double-buffered inputs + outputs + scratch).
    vmem_est = (2 * block_n * c * itemsize     # logits tiles
                + 2 * block_n * 4              # targets tiles
                + 2 * c * 4                    # alpha (resident)
                + 2 * 8 * 128 * 4              # per-core partial output
                + block_n * 128 * 4)           # accumulator scratch (lane-pad)
    vmem_limit = int(min(max(2 * vmem_est + (2 << 20), 16 << 20), 48 << 20))

    partials = pl.pallas_call(
        kernel,
        out_shape=jax.ShapeDtypeStruct((num_cores, 8, 128), jnp.float32),
        grid_spec=pltpu.PrefetchScalarGridSpec(
            num_scalar_prefetch=0,
            grid=(num_cores, nblk_per_core),
            in_specs=[
                pl.BlockSpec((block_n, c),
                             lambda p, i: (p * nblk_per_core + i, 0)),
                pl.BlockSpec((block_n, 1),
                             lambda p, i: (p * nblk_per_core + i, 0)),
                pl.BlockSpec((1, c), lambda p, i: (0, 0)),
            ],
            out_specs=pl.BlockSpec((1, 8, 128), lambda p, i: (p, 0, 0)),
            scratch_shapes=[pltpu.VMEM((block_n, 1), jnp.float32)],
        ),
        compiler_params=pltpu.CompilerParams(
            dimension_semantics=("parallel", "arbitrary"),
            vmem_limit_bytes=vmem_limit),
    )(x, t, a)

    total = jnp.sum(partials[:, 0, 0])
    if reduction == "mean":
        return total / jnp.float32(n)
    return total


def _focal_loss_ref(inputs, targets, *, gamma=2, alpha=None, reduction="mean"):
    logp = jax.nn.log_softmax(inputs.astype(jnp.float32), axis=1)
    logp_t = jnp.take_along_axis(logp, targets[:, None], axis=1)
    p_t = jnp.exp(logp_t)
    w = (1.0 - p_t) ** gamma
    if alpha is not None:
        w = w * jnp.asarray(alpha, jnp.float32)[targets][:, None]
    loss = -w * logp_t
    return loss.mean() if reduction == "mean" else loss.sum()


if __name__ == "__main__":
    key = jax.random.PRNGKey(0)
    k1, k2, k3, k4 = jax.random.split(key, 4)

    # Default module config: gamma=2, alpha=None, reduction='mean'.
    N, C = 16, 8
    logits = jax.random.normal(k1, (N, C), dtype=jnp.float32)
    targets = jax.random.randint(k2, (N,), 0, C, dtype=jnp.int32)

    out = focal_loss(logits, targets, gamma=2, alpha=None, reduction="mean")
    out = jax.block_until_ready(out)
    ref = _focal_loss_ref(logits, targets, gamma=2, alpha=None, reduction="mean")
    assert jnp.allclose(out, ref, rtol=1e-5, atol=1e-5), (out, ref)

    # Non-multiple-of-tile batch + alpha weighting + 'sum' (exercises the
    # padding mask, the dual-partition grid, and the auto-sized row tile).
    N2, C2 = 300, 64
    logits2 = jax.random.normal(k3, (N2, C2), dtype=jnp.float32)
    targets2 = jax.random.randint(k4, (N2,), 0, C2, dtype=jnp.int32)
    alpha = jnp.linspace(0.5, 1.5, C2, dtype=jnp.float32)
    out2 = focal_loss(logits2, targets2, gamma=2, alpha=alpha, reduction="sum")
    out2 = jax.block_until_ready(out2)
    ref2 = _focal_loss_ref(logits2, targets2, gamma=2, alpha=alpha,
                           reduction="sum")
    assert jnp.allclose(out2, ref2, rtol=1e-4, atol=1e-4), (out2, ref2)

    # bf16 logits stream at native width (half the HBM bytes); math is f32.
    out_bf = focal_loss(logits2.astype(jnp.bfloat16), targets2,
                        gamma=2, alpha=alpha, reduction="sum")
    out_bf = jax.block_until_ready(out_bf)
    ref_bf = _focal_loss_ref(logits2.astype(jnp.bfloat16), targets2,
                             gamma=2, alpha=alpha, reduction="sum")
    assert jnp.allclose(out_bf, ref_bf, rtol=1e-3, atol=1e-3), (out_bf, ref_bf)

    print("KERNEL_OK")
</pallas_src>

<mosaic_0001>
module attributes {stable_mosaic.version = 11 : i64} {
  func.func @_focal_loss_kernel(%arg0: i32, %arg1: i32, %arg2: memref<8x8xf32, #tpu.memory_space<vmem>>, %arg3: memref<8x1xi32, #tpu.memory_space<vmem>>, %arg4: memref<1x8xf32, #tpu.memory_space<vmem>>, %arg5: memref<1x8x128xf32, #tpu.memory_space<vmem>>, %arg6: memref<8x1xf32, #tpu.memory_space<vmem>>) attributes {dimension_semantics = [#tpu.dimension_semantics<parallel>, #tpu.dimension_semantics<arbitrary>], iteration_bounds = array<i64: 2, 1>, scalar_prefetch = 0 : i64, scratch_operands = 1 : i64, tpu.core_type = #tpu.core_type<tc>, window_params = [{transform_indices = @transform_0, window_bounds = array<i64: 8, 8>}, {transform_indices = @transform_1, window_bounds = array<i64: 8, 1>}, {pipeline_mode = #tpu.pipeline_mode<synchronous>, transform_indices = @transform_2, window_bounds = array<i64: 1, 8>}, {transform_indices = @transform_3, window_bounds = array<i64: 1, 8, 128>}]} {
    %c0_i32 = arith.constant 0 : i32
    %0 = arith.cmpi eq, %arg1, %c0_i32 : i32
    %1 = arith.extui %0 : i1 to i32
    %c0_i32_0 = arith.constant 0 : i32
    %2 = arith.cmpi ne, %1, %c0_i32_0 : i32
    scf.if %2 {
      %cst_17 = arith.constant 0.000000e+00 : f32
      %41 = vector.broadcast %cst_17 : f32 to vector<8x1xf32>
      %c0_18 = arith.constant 0 : index
      %c0_19 = arith.constant 0 : index
      %42 = vector.load %arg6[%c0_18, %c0_19] : memref<8x1xf32, #tpu.memory_space<vmem>>, vector<8x1xf32>
      tpu.vector_store %arg6[%c0_18, %c0_19], %41 {strides = array<i32>} : memref<8x1xf32, #tpu.memory_space<vmem>>, vector<8x1xf32>,
    } else {
    }
    %c0 = arith.constant 0 : index
    %c0_1 = arith.constant 0 : index
    %3 = vector.load %arg2[%c0, %c0_1] : memref<8x8xf32, #tpu.memory_space<vmem>>, vector<8x8xf32>
    %cst = arith.constant dense<0xFF800000> : vector<8xf32>
    %4 = vector.multi_reduction <maximumf>, %3, %cst [1] : vector<8x8xf32> to vector<8xf32>
    %5 = vector.shape_cast %4 : vector<8xf32> to vector<8x1xf32>
    %6 = vector.broadcast %5 : vector<8x1xf32> to vector<8x8xf32>
    %7 = arith.subf %3, %6 : vector<8x8xf32>
    %8 = math.exp %7 : vector<8x8xf32>
    %cst_2 = arith.constant dense<0.000000e+00> : vector<8xf32>
    %9 = vector.multi_reduction <add>, %8, %cst_2 [1] : vector<8x8xf32> to vector<8xf32>
    %10 = vector.shape_cast %9 : vector<8xf32> to vector<8x1xf32>
    %11 = math.log %10 : vector<8x1xf32>
    %c0_3 = arith.constant 0 : index
    %c0_4 = arith.constant 0 : index
    %12 = vector.load %arg3[%c0_3, %c0_4] : memref<8x1xi32, #tpu.memory_space<vmem>>, vector<8x1xi32>
    %13 = tpu.iota {dimensions = array<i32: 1>} : vector<8x8xi32>
    %14 = vector.broadcast %12 : vector<8x1xi32> to vector<8x8xi32>
    %15 = arith.cmpi eq, %13, %14 : vector<8x8xi32>
    %16 = arith.extui %15 : vector<8x8xi1> to vector<8x8xi32>
    %17 = arith.sitofp %16 : vector<8x8xi32> to vector<8x8xf32>
    %18 = arith.mulf %7, %17 : vector<8x8xf32>
    %cst_5 = arith.constant dense<0.000000e+00> : vector<8xf32>
    %19 = vector.multi_reduction <add>, %18, %cst_5 [1] : vector<8x8xf32> to vector<8xf32>
    %20 = vector.shape_cast %19 : vector<8xf32> to vector<8x1xf32>
    %21 = arith.subf %20, %11 : vector<8x1xf32>
    %22 = math.exp %21 : vector<8x1xf32>
    %c0_6 = arith.constant 0 : index
    %c0_7 = arith.constant 0 : index
    %23 = vector.load %arg4[%c0_6, %c0_7] : memref<1x8xf32, #tpu.memory_space<vmem>>, vector<1x8xf32>
    %24 = vector.broadcast %23 : vector<1x8xf32> to vector<8x8xf32>
    %25 = arith.mulf %24, %17 : vector<8x8xf32>
    %cst_8 = arith.constant dense<0.000000e+00> : vector<8xf32>
    %26 = vector.multi_reduction <add>, %25, %cst_8 [1] : vector<8x8xf32> to vector<8xf32>
    %27 = vector.shape_cast %26 : vector<8xf32> to vector<8x1xf32>
    %cst_9 = arith.constant 1.000000e+00 : f32
    %28 = vector.broadcast %cst_9 : f32 to vector<8x1xf32>
    %29 = arith.subf %28, %22 : vector<8x1xf32>
    %30 = arith.mulf %29, %29 : vector<8x1xf32>
    %31 = arith.mulf %30, %27 : vector<8x1xf32>
    %cst_10 = arith.constant 0.000000e+00 : f32
    %32 = vector.broadcast %cst_10 : f32 to vector<8x1xf32>
    %33 = arith.subf %32, %31 : vector<8x1xf32>
    %34 = arith.mulf %33, %21 : vector<8x1xf32>
    %c0_11 = arith.constant 0 : index
    %c0_12 = arith.constant 0 : index
    %35 = vector.load %arg6[%c0_11, %c0_12] : memref<8x1xf32, #tpu.memory_space<vmem>>, vector<8x1xf32>
    %36 = arith.addf %35, %34 : vector<8x1xf32>
    %c0_13 = arith.constant 0 : index
    %c0_14 = arith.constant 0 : index
    %37 = vector.load %arg6[%c0_13, %c0_14] : memref<8x1xf32, #tpu.memory_space<vmem>>, vector<8x1xf32>
    tpu.vector_store %arg6[%c0_13, %c0_14], %36 {strides = array<i32>} : memref<8x1xf32, #tpu.memory_space<vmem>>, vector<8x1xf32>,
    %c0_i32_15 = arith.constant 0 : i32
    %38 = arith.cmpi eq, %arg1, %c0_i32_15 : i32
    %39 = arith.extui %38 : i1 to i32
    %c0_i32_16 = arith.constant 0 : i32
    %40 = arith.cmpi ne, %39, %c0_i32_16 : i32
    scf.if %40 {
      %c0_17 = arith.constant 0 : index
      %c0_18 = arith.constant 0 : index
      %41 = vector.load %arg6[%c0_17, %c0_18] : memref<8x1xf32, #tpu.memory_space<vmem>>, vector<8x1xf32>
      %42 = vector.shape_cast %41 : vector<8x1xf32> to vector<1x8x1xf32>
      %cst_19 = arith.constant dense<0.000000e+00> : vector<1xf32>
      %43 = vector.multi_reduction <add>, %42, %cst_19 [1, 2] : vector<1x8x1xf32> to vector<1xf32>
      %44 = vector.shape_cast %43 : vector<1xf32> to vector<1x1x1xf32>
      %45 = vector.extract %44[0, 0, 0] : f32 from vector<1x1x1xf32>
      %46 = vector.broadcast %45 : f32 to vector<1x8x128xf32>
      %c0_20 = arith.constant 0 : index
      %c0_21 = arith.constant 0 : index
      %c0_22 = arith.constant 0 : index
      %47 = vector.load %arg5[%c0_20, %c0_21, %c0_22] : memref<1x8x128xf32, #tpu.memory_space<vmem>>, vector<1x8x128xf32>
      tpu.vector_store %arg5[%c0_20, %c0_21, %c0_22], %46 {strides = array<i32>} : memref<1x8x128xf32, #tpu.memory_space<vmem>>, vector<1x8x128xf32>,
    } else {
    }
    return
  }
  func.func @transform_0(%arg0: i32, %arg1: i32) -> (i32, i32) {
    %c1_i32 = arith.constant 1 : i32
    %0 = arith.muli %arg0, %c1_i32 : i32
    %1 = arith.addi %0, %arg1 : i32
    %c0_i32 = arith.constant 0 : i32
    %c0_i32_0 = arith.constant 0 : i32
    return %1, %c0_i32 : i32, i32
  }
  func.func @transform_1(%arg0: i32, %arg1: i32) -> (i32, i32) {
    %c1_i32 = arith.constant 1 : i32
    %0 = arith.muli %arg0, %c1_i32 : i32
    %1 = arith.addi %0, %arg1 : i32
    %c0_i32 = arith.constant 0 : i32
    %c0_i32_0 = arith.constant 0 : i32
    return %1, %c0_i32 : i32, i32
  }
  func.func @transform_2(%arg0: i32, %arg1: i32) -> (i32, i32) {
    %c0_i32 = arith.constant 0 : i32
    %c0_i32_0 = arith.constant 0 : i32
    %c0_i32_1 = arith.constant 0 : i32
    return %c0_i32, %c0_i32_0 : i32, i32
  }
  func.func @transform_3(%arg0: i32, %arg1: i32) -> (i32, i32, i32) {
    %c0_i32 = arith.constant 0 : i32
    %c0_i32_0 = arith.constant 0 : i32
    %c0_i32_1 = arith.constant 0 : i32
    return %arg0, %c0_i32, %c0_i32_0 : i32, i32, i32
  }
}

</mosaic_0001>

<bundles_post_ra>
// kernel: tpu_custom_call.1
= control target key start
LH: loop header
LB: loop body
LE: loop exit
PB: predicated region body
PF: predicated region fallthrough
CT: control target
= control target key end

     0   :  { %8 = vsyncpa [#allocation4], 0  ;;  %s681_s0 = inlined_call_operand.vmem [shape: f32[16,8], index: 0, kind: input, shape index: {}]   ;;  %s682_s1 = inlined_call_operand.vmem [shape: s32[16,1], index: 1, kind: input, shape index: {}]   ;;  %s683_s2 = inlined_call_operand.vmem [shape: f32[1,8], index: 2, kind: input, shape index: {}]   ;;  %s684_s3 = inlined_call_operand.hbm [shape: f32[2,8,128], index: 3, kind: output, shape index: {}]  }
   0x1   :  { %10 = vsyncpa [#allocation4 + $0x1], 0  ;;  %s556_s12 = smov 0   ;;  %s558_s13 = smov 0  }
   0x2   :  { %s560_s14 = smov 0   ;;  %s562_s15 = smov 0  }
   0x3   :  { %s564_s16 = smov 0   ;;  %s566_s17 = smov 0  }
   0x4 LB: > { %s373_s18 = sadd.s32 4294967295, %s531_s17   ;;  %s374_s19 = sadd.s32 4294967294, %s531_s17   ;;  %s531_s17 = sphi %s566_s17, %s16_s17   ;;  %s527_s16 = sphi %s564_s16, %s691_s16   ;;  %s523_s15 = sphi %s562_s15, %s690_s15   ;;  %s519_s14 = sphi %s560_s14, %s689_s14   ;;  %s515_s13 = sphi %s558_s13, %s688_s13   ;;  %s511_s12 = sphi %s556_s12, %s687_s12  }
   0x5   : > { %s28_s20 = sadd.s32 1, %s527_s16  ;;  %s112_s21 = sadd.s32 1, %s519_s14 }
   0x6   : > { %p30_p0 = scmp.ge.s32.totalorder %s28_s20, 2  ;;  %p122_p1 = scmp.ne.s32.totalorder %s519_s14, %s515_s13 }
   0x7   : > { %p123_p2 = scmp.eq.s32.totalorder %s373_s18, 1  ;;  %p128_p3 = scmp.ne.s32.totalorder %s515_s13, %s511_s12 }
   0x8   : > { %s693_s20 = smov (%p30_p0, %s28_s20), 0  ;;  %p129_p5 = scmp.eq.s32.totalorder %s374_s19, 1 }
   0x9   : > { %p596_p4 = por %p123_p2, %p122_p1  ;;  %s109_s23 = ssub.s32 %s527_s16, %s693_s20 }
   0xa   : > { %p377_p6 = scmp.ge.s32.totalorder %s531_s17, 1  ;;  %p110_p7 = scmp.eq.s32.totalorder %s109_s23, 0 }
   0xb   : > { %p603_p8 = por %p129_p5, %p128_p3  ;;  %p168_p9 = scmp.lt.s32.totalorder %s531_s17, 3 }
   0xc   : > { %s609_s25 = scalar_select %p110_p7, %s519_s14, %s112_s21  }
   0xd   : > { %p169_p10 = pnand %p377_p6, %p168_p9 }
   0xe   : > { %p198_p11 = scmp.lt.s32.totalorder (!%p169_p10), %s523_s15, 1  ;;  %v533_v0 = vmov (!%p169_p10), 0   ;;  %vm216_vm0 = vcmask (!%p169_p10), 64512   ;;  %v229_v6 = vlaneseq (!%p169_p10)  ;;  %v534_v10 = vmov (!%p169_p10), 0.0   ;;  %v382_v13 = vld [vmem:[%s683_s2] ss:$0 sm:$0xff] (!%p169_p10) }
   0xf   : > { %172 = sbr.rel (%p169_p10) target bundleno = 596 (0x254), region = 32  ;;  %446 = vset.pattern.permute.xlu0 (!%p169_p10), %v533_v0  ;;  %vm213_vm2 = vcmask (!%p169_p10), 7168   ;;  %s194_s9 = sand.u32 (!%p169_p10), 1, %s515_s13  }
  0x10   : > { %v230_v8 = vand.u32 (!%p169_p10), 127, %v229_v6  ;;  %214 = vst.msk [vmem:[#allocation2] sm:$0xff] (!%p169_p10), %vm213_vm2, %v534_v10  ;;  %s378_s10 = sshll.u32 (!%p169_p10), %s194_s9, 3  ;;  %s384_s19 = sshll.u32 (!%p169_p10), %s523_s15, 7 }
  0x11   : > { %s196_s11 = scalar_lea.vmem (!%p169_p10), [#allocation3], %s378_s10  ;;  %s281_s28 = scalar_lea.sflag (!%p169_p10), [#allocation4], %s194_s9 }
  0x12   : > { %s294_s18 = sshll.u32 (!%p169_p10), %s196_s11, 4  ;;  %s631_s18 = int_to_ptr.vmem [resolvable:$true] %s294_s18 }
  0x13   : > { %s453_s29 = scalar_lea.vmem (!%p169_p10), %s631_s18, 128 }
  0x14   : > { %p454_p12 = scmp.ne.s32.totalorder (!%p169_p10), %s631_s18, %s453_s29 }
  0x16   : > { %s199_s26 = scalar_select %p198_p11, %s523_s15, 1 }
  0x17   : > { %v260_v31 = vld [vmem:[#allocation2] sm:$0xff]  ;;  %p455_p13 = pnand %p454_p12, %p596_p4  ;;  %s535_s15 = smov [#allocation3]  }
  0x18   : > { %s379_s27 = sshll.u32 %s199_s26, 3 }
  0x19   : > { %s201_s30 = scalar_lea.vmem %s681_s0, %s379_s27  ;;  %s207_s6 = scalar_lea.vmem %s682_s1, %s379_s27 }
  0x1a   : > { %v215_v1 = vld [vmem:[%s201_s30] sm:$0xff]  ;;  %s636_s27 = scalar_lea.hbm %s684_s3, %s384_s19  ;;  %p456_p0 = pneg %p455_p13 }
  0x1b   : > { %v217_v2 = vsel %vm216_vm0, %v215_v1, -inf  ;;  %v228_v3 = vld [vmem:[%s207_s6] sm:$0xff]  ;;  %s457_s30 = sshll.u32 %s535_s15, 4  ;;  %s458_s30 = int_to_ptr.vmem [resolvable:$false] %s457_s30 }
  0x1c   : > { %218 = vmax.xlane.f32.xlu0 %v217_v2  ;;  %s459_s4 = scalar_lea.vmem %s458_s30, 256  ;;  %p460_p1 = scmp.lt.s32.totalorder %s631_s18, %s458_s30 }
  0x1d   : > { %p461_p2 = scmp.lt.s32.totalorder %s459_s4, %s453_s29 }
  0x1f   : > { %p462_p3 = por %p461_p2, %p460_p1 }
  0x21   : > { %p463_p5 = pnand %p462_p3, %p456_p0 }
  0x32   : > { %232 = vperm.xlu0 %446, %v228_v3  }
  0xa9   : > { %v219_v4 = vpop.xlane.xlu0 %218 }
  0xaa   : > { %v220_v5 = vsub.f32 %v215_v1, %v219_v4 }
  0xac   : > { %v221_v7 = vmul.f32 1.442695, %v220_v5 }
  0xae   : > { %447 = vpow2.f32 %v221_v7 }
  0xb1   : > { %v233_v9 = vpop.permute.xlu0 %232 }
  0xb2   : > { %vm234_vm1 = vcmp.eq.s32.totalorder %v230_v8, %v233_v9 }
  0xb3   : > { %v381_v11 = vsel %vm234_vm1, 1.0, %v534_v10 }
  0xb4   : > { %v237_v15 = vmul.f32 %v381_v11, %v220_v5  ;;  %v251_v16 = vmul.f32 %v382_v13, %v381_v11 }
  0xb6   : > { %v238_v17 = vsel %vm216_vm0, %v237_v15, 0.0  ;;  %v252_v18 = vsel %vm216_vm0, %v251_v16, 0.0 }
  0xb8   : > { %v448_v12 = vpop.eup %447 }
  0xb9   : > { %v223_v14 = vsel %vm216_vm0, %v448_v12, 0.0 }
  0xba   : > { %224 = vadd.xlane.f32.xlu1 %v223_v14 }
  0xbe   : > { %239 = vadd.xlane.f32.xlu1 %v238_v17 }
  0xc2   : > { %253 = vadd.xlane.f32.xlu1 %v252_v18 }
 0x147   : > { %v225_v19 = vpop.xlane.xlu1 %224 }
 0x148   : > { %449 = vlog2.f32 %v225_v19 }
 0x14b   : > { %v240_v22 = vpop.xlane.xlu1 %239 }
 0x14f   : > { %v254_v28 = vpop.xlane.xlu1 %253 }
 0x152   : > { %v450_v20 = vpop.eup %449 }
 0x153   : > { %v227_v21 = vmul.f32 0.6931472, %v450_v20 }
 0x155   : > { %v241_v23 = vsub.f32 %v240_v22, %v227_v21 }
 0x157   : > { %v242_v24 = vmul.f32 1.442695, %v241_v23 }
 0x159   : > { %451 = vpow2.f32 %v242_v24 }
 0x163   : > { %v452_v25 = vpop.eup %451 }
 0x164   : > { %v255_v26 = vsub.f32 1.0, %v452_v25 }
 0x166   : > { %v256_v27 = vmul.f32 %v255_v26, %v255_v26 }
 0x168   : > { %v257_v29 = vmul.f32 %v256_v27, %v254_v28 }
 0x16a   : > { %v258_v30 = vsub.f32 0.0, %v257_v29 }
 0x16c   : > { %v259_v32 = vmul.f32 %v258_v30, %v241_v23 }
 0x16e   : > { %v261_v33 = vadd.f32 %v260_v31, %v259_v32 }
 0x170   : > { %263 = vst.msk [vmem:[#allocation2] sm:$0xff] %vm213_vm2, %v261_v33 }
 0x177   : > { %v267_v34 = vld [vmem:[#allocation2] sm:$0xff] }
 0x178   : > { %v268_v35 = vsel %vm213_vm2, %v267_v34, 0.0 }
 0x179   : > { %269 = vadd.xlane.f32.xlu1 %v268_v35 }
 0x206   : > { %v270_v36 = vpop.xlane.xlu1 %269 }
 0x207   : > { %v271_v37 = vrot.slane %v270_v36, 4 }
 0x209   : > { %v272_v38 = vadd.f32 %v271_v37, %v270_v36 }
 0x20b   : > { %v273_v39 = vrot.slane %v272_v38, 2 }
 0x20d   : > { %v274_v40 = vadd.f32 %v273_v39, %v272_v38 }
 0x20f   : > { %v275_v41 = vrot.slane %v274_v40, 1 }
 0x211   : > { %v276_v42 = vadd.f32 %v275_v41, %v274_v40 }
 0x213   : > { %387 = vpush %v276_v42 }
 0x244   : > { %s388_s21 = spop %387 }
 0x245   : > { %v278_v43 = vstv %s388_s21 }
 0x246   : > { %279 = vst [vmem:[%s196_s11] sm:$0xff] %v278_v43 }
 0x247   : > { %466 = shalt.err (!%p463_p5)
}
 0x248   : > { %s467_s5 = scalar_lea.hbm %s636_s27, 128  ;;  %s471_s8 = scalar_lea.hbm %s684_s3, 256 }
 0x249   : > { %p468_p6 = scmp.ne.s32.totalorder %s636_s27, %s467_s5  ;;  %p472_p10 = scmp.lt.u32.totalorder %s636_s27, %s684_s3 }
 0x24a   : > { %p473_p11 = scmp.lt.u32.totalorder %s471_s8, %s467_s5  ;;  %p475_p13 = scmp.lt.u32.totalorder %s467_s5, %s636_s27 }
 0x24b   : > { %p469_p7 = pnand %p468_p6, %p596_p4 }
 0x24c   : > { %p474_p12 = por %p473_p11, %p472_p10 }
 0x24d   : > { %p470_p9 = pneg %p469_p7 }
 0x24e   : > { %p476_p0 = por %p475_p13, %p474_p12 }
 0x250   : > { %p477_p1 = pnand %p476_p0, %p470_p9 }
 0x252   : > { %480 = shalt.err (!%p477_p1)
}
 0x253   : > { %389 = dma.vmem_to_hbm [thread:$0]  (%p596_p4), %s631_s18, 128, %s636_s27, %s281_s28  }
 0x254 PF: > { %p395_p2 = scmp.ge.s32.totalorder %s531_s17, 2  ;;  %s306_s11 = sand.u32 1, %s511_s12  }
 0x255   : > { %s307_s19 = scalar_lea.sflag [#allocation4], %s306_s11 }
 0x256   : > { %p392_p3 = pnand %p395_p2, %p603_p8 }
 0x258   : > { %506 = dma.done.wait (!%p392_p3), %s307_s19, 128  }
 0x259   : > { %508 = vsyncadd (!%p392_p3), %s307_s19, 4294967168  ;;  %s16_s17 = sadd.s32 1, %s531_s17   ;;  %s687_s12 = smov %s515_s13 }
 0x25a   : > { %p13_p5 = scmp.ge.s32.totalorder %s16_s17, 4   ;;  %s688_s13 = smov %s519_s14 }
 0x25b   : > { %s689_s14 = smov %s609_s25  ;;  %s690_s15 = smov %s527_s16 }
 0x25c   : > { %s691_s16 = smov %s693_s20  ;;  %15 = sbr.rel (!%p13_p5) target bundleno = 4 (0x4), region = 78 }
 0x263   :  { %312 = vsyncpa [#allocation4], 1 }
 0x264   :  { %314 = vsyncpa [#allocation4 + $0x1], 1 }

</bundles_post_ra>
